<compile_context>
chip_gen: v6e
topology: v6e:2x2x1
jax: 0.10.0
libtpu: 0.0.40
codegen_flags: <defaults>
</compile_context>

<pallas_src>
import jax
import jax.numpy as jnp
from jax import lax
from jax.experimental import pallas as pl
from jax.experimental.pallas import tpu as pltpu

ATTN_WINDOW = 5
NEG_INF = -1e30  # large negative; exp(NEG_INF - m) underflows to exactly 0 in f32


def _local_attention_kernel(x_ref, w_ref, b_ref, o_ref):
    # x_ref: [Bb, L + 2w, D]  zero-padded along the sequence axis (VMEM)
    # w_ref: [1, D]           attn_score Linear weight (VMEM)
    # b_ref: [1]              attn_score Linear bias (SMEM scalar)
    # o_ref: [Bb, L, D]       output (VMEM)
    Bb, Lp, D = x_ref.shape
    L = o_ref.shape[1]
    W = (Lp - L) // 2  # static window size

    x = x_ref[...]                      # keep input dtype (bf16 stays bf16)
    wvec = w_ref[...]                   # [1, D]
    bias = b_ref[0].astype(jnp.float32)

    # Query-independent per-position scores over the padded axis (f32 softmax math).
    raw = jnp.sum((x * wvec).astype(jnp.float32), axis=-1) + bias        # [Bb, Lp]
    pos = lax.broadcasted_iota(jnp.int32, (Bb, Lp), 1)
    in_range = (pos >= W) & (pos < W + L)
    s_pad = jnp.where(in_range, raw, NEG_INF)                            # [Bb, Lp]

    # Shifted score views: s_slices[d][b, t] == score of position (t + d - W),
    # or NEG_INF if that position is outside [0, L).
    s_slices = [s_pad[:, d:d + L] for d in range(2 * W + 1)]             # each [Bb, L]

    # Per-query (per-window) max for a numerically stable softmax.
    m = s_slices[0]
    for s in s_slices[1:]:
        m = jnp.maximum(m, s)                                            # [Bb, L]

    # Banded softmax-weighted accumulation.  Invalid offsets have weight 0, so
    # the zero-padded x rows never contribute.
    z = jnp.zeros((Bb, L), jnp.float32)
    acc = jnp.zeros((Bb, L, D), jnp.float32)
    for d in range(2 * W + 1):
        e = jnp.exp(s_slices[d] - m)                                     # [Bb, L]
        z = z + e
        acc = acc + e[:, :, None] * x[:, d:d + L, :]                     # [Bb, L, D]

    inv = pl.reciprocal(z, approx=True)      # EUP slot
    inv = inv * (2.0 - z * inv)              # one Newton step -> ~f32 accuracy
    o_ref[...] = (acc * inv[:, :, None]).astype(o_ref.dtype)


def local_attention(rnn_output, weight, bias, attn_window=ATTN_WINDOW):
    """rnn_output: [B, L, D]; weight: [1, D]; bias: [1] -> [B, L, D]."""
    B, L, D = rnn_output.shape
    W = attn_window
    Lp = L + 2 * W

    # Zero-pad the sequence axis so every window shift is a static, in-bounds slice.
    x_pad = jnp.pad(rnn_output, ((0, 0), (W, W), (0, 0)))
    weight2d = weight.reshape(1, D).astype(rnn_output.dtype)
    bias1 = bias.reshape(1).astype(jnp.float32)

    # Fold the whole (small) batch into one grid step; bigger batches split into
    # parallel steps of block_b batch elements each.
    block_b = min(B, 8)
    grid = (pl.cdiv(B, block_b),)

    return pl.pallas_call(
        _local_attention_kernel,
        out_shape=jax.ShapeDtypeStruct((B, L, D), rnn_output.dtype),
        grid_spec=pltpu.PrefetchScalarGridSpec(
            num_scalar_prefetch=0,
            grid=grid,
            in_specs=[
                pl.BlockSpec((block_b, Lp, D), lambda i: (i, 0, 0)),
                pl.BlockSpec((1, D), lambda i: (0, 0)),
                pl.BlockSpec(memory_space=pltpu.MemorySpace.SMEM),
            ],
            out_specs=pl.BlockSpec((block_b, L, D), lambda i: (i, 0, 0)),
        ),
        compiler_params=pltpu.CompilerParams(
            dimension_semantics=("parallel",),
            vmem_limit_bytes=32 * 1024 * 1024,
        ),
    )(x_pad, weight2d, bias1)


def local_attention_ref(rnn_output, weight, bias, attn_window=ATTN_WINDOW):
    """Pure-JAX reference mirroring the PyTorch loop exactly."""
    B, L, D = rnn_output.shape
    w = weight.reshape(D)
    outs = []
    for t in range(L):
        start = max(0, t - attn_window)
        end = min(L, t + attn_window + 1)
        ctx = rnn_output[:, start:end, :]                       # [B, win, D]
        scores = jnp.einsum("bwd,d->bw", ctx, w) + bias[0]      # [B, win]
        alpha = jax.nn.softmax(scores, axis=1)[..., None]       # [B, win, 1]
        outs.append(jnp.sum(ctx * alpha, axis=1, keepdims=True))
    return jnp.concatenate(outs, axis=1)


if __name__ == "__main__":
    key = jax.random.PRNGKey(0)
    B, L, D = 2, 8, 32  # batch, seq_len, hidden_dim

    k_x, k_w, k_b = jax.random.split(key, 3)
    x = jax.random.normal(k_x, (B, L, D), dtype=jnp.float32)
    # Deterministic parameters for attn_score = nn.Linear(hidden_dim, 1)
    weight = jax.random.normal(k_w, (1, D), dtype=jnp.float32) * 0.1
    bias = jax.random.normal(k_b, (1,), dtype=jnp.float32) * 0.1

    out = jax.block_until_ready(local_attention(x, weight, bias))

    ref = local_attention_ref(x, weight, bias)
    assert out.shape == (B, L, D)
    assert jnp.allclose(out, ref, atol=1e-4, rtol=1e-4), "mismatch vs reference"

    print("KERNEL_OK")
</pallas_src>

<mosaic_0001>
module attributes {stable_mosaic.version = 11 : i64} {
  func.func @_local_attention_kernel(%arg0: i32, %arg1: memref<2x18x32xf32, #tpu.memory_space<vmem>>, %arg2: memref<1x32xf32, #tpu.memory_space<vmem>>, %arg3: memref<1xf32, #tpu.memory_space<smem>>, %arg4: memref<2x8x32xf32, #tpu.memory_space<vmem>>) attributes {dimension_semantics = [#tpu.dimension_semantics<parallel>], iteration_bounds = array<i64: 1>, scalar_prefetch = 0 : i64, scratch_operands = 0 : i64, tpu.core_type = #tpu.core_type<tc>, window_params = [{transform_indices = @transform_0, window_bounds = array<i64: 2, 18, 32>}, {pipeline_mode = #tpu.pipeline_mode<synchronous>, transform_indices = @transform_1, window_bounds = array<i64: 1, 32>}, {transform_indices = @transform_2, window_bounds = array<i64: 1>}, {transform_indices = @transform_3, window_bounds = array<i64: 2, 8, 32>}]} {
    %c0 = arith.constant 0 : index
    %c0_0 = arith.constant 0 : index
    %c0_1 = arith.constant 0 : index
    %0 = vector.load %arg1[%c0, %c0_0, %c0_1] : memref<2x18x32xf32, #tpu.memory_space<vmem>>, vector<2x18x32xf32>
    %c0_2 = arith.constant 0 : index
    %c0_3 = arith.constant 0 : index
    %1 = vector.load %arg2[%c0_2, %c0_3] : memref<1x32xf32, #tpu.memory_space<vmem>>, vector<1x32xf32>
    %c0_4 = arith.constant 0 : index
    %2 = memref.load %arg3[%c0_4] : memref<1xf32, #tpu.memory_space<smem>>
    %3 = vector.shape_cast %1 : vector<1x32xf32> to vector<1x1x32xf32>
    %4 = vector.broadcast %3 : vector<1x1x32xf32> to vector<2x18x32xf32>
    %5 = arith.mulf %0, %4 : vector<2x18x32xf32>
    %cst = arith.constant dense<0.000000e+00> : vector<2x18xf32>
    %6 = vector.multi_reduction <add>, %5, %cst [2] : vector<2x18x32xf32> to vector<2x18xf32>
    %7 = vector.broadcast %2 : f32 to vector<2x18xf32>
    %8 = arith.addf %6, %7 : vector<2x18xf32>
    %9 = tpu.iota {dimensions = array<i32: 1>} : vector<2x18xi32>
    %c5_i32 = arith.constant 5 : i32
    %10 = vector.broadcast %c5_i32 : i32 to vector<2x18xi32>
    %11 = arith.cmpi sge, %9, %10 : vector<2x18xi32>
    %c13_i32 = arith.constant 13 : i32
    %12 = vector.broadcast %c13_i32 : i32 to vector<2x18xi32>
    %13 = arith.cmpi slt, %9, %12 : vector<2x18xi32>
    %14 = arith.andi %11, %13 : vector<2x18xi1>
    %cst_5 = arith.constant -1.000000e+30 : f32
    %15 = vector.broadcast %cst_5 : f32 to vector<2x18xf32>
    %16 = arith.select %14, %8, %15 : vector<2x18xi1>, vector<2x18xf32>
    %17 = vector.extract_strided_slice %16 {offsets = [0, 0], sizes = [2, 8], strides = [1, 1]} : vector<2x18xf32> to vector<2x8xf32>
    %18 = vector.extract_strided_slice %16 {offsets = [0, 1], sizes = [2, 8], strides = [1, 1]} : vector<2x18xf32> to vector<2x8xf32>
    %19 = vector.extract_strided_slice %16 {offsets = [0, 2], sizes = [2, 8], strides = [1, 1]} : vector<2x18xf32> to vector<2x8xf32>
    %20 = vector.extract_strided_slice %16 {offsets = [0, 3], sizes = [2, 8], strides = [1, 1]} : vector<2x18xf32> to vector<2x8xf32>
    %21 = vector.extract_strided_slice %16 {offsets = [0, 4], sizes = [2, 8], strides = [1, 1]} : vector<2x18xf32> to vector<2x8xf32>
    %22 = vector.extract_strided_slice %16 {offsets = [0, 5], sizes = [2, 8], strides = [1, 1]} : vector<2x18xf32> to vector<2x8xf32>
    %23 = vector.extract_strided_slice %16 {offsets = [0, 6], sizes = [2, 8], strides = [1, 1]} : vector<2x18xf32> to vector<2x8xf32>
    %24 = vector.extract_strided_slice %16 {offsets = [0, 7], sizes = [2, 8], strides = [1, 1]} : vector<2x18xf32> to vector<2x8xf32>
    %25 = vector.extract_strided_slice %16 {offsets = [0, 8], sizes = [2, 8], strides = [1, 1]} : vector<2x18xf32> to vector<2x8xf32>
    %26 = vector.extract_strided_slice %16 {offsets = [0, 9], sizes = [2, 8], strides = [1, 1]} : vector<2x18xf32> to vector<2x8xf32>
    %27 = vector.extract_strided_slice %16 {offsets = [0, 10], sizes = [2, 8], strides = [1, 1]} : vector<2x18xf32> to vector<2x8xf32>
    %28 = arith.maximumf %17, %18 : vector<2x8xf32>
    %29 = arith.maximumf %28, %19 : vector<2x8xf32>
    %30 = arith.maximumf %29, %20 : vector<2x8xf32>
    %31 = arith.maximumf %30, %21 : vector<2x8xf32>
    %32 = arith.maximumf %31, %22 : vector<2x8xf32>
    %33 = arith.maximumf %32, %23 : vector<2x8xf32>
    %34 = arith.maximumf %33, %24 : vector<2x8xf32>
    %35 = arith.maximumf %34, %25 : vector<2x8xf32>
    %36 = arith.maximumf %35, %26 : vector<2x8xf32>
    %37 = arith.maximumf %36, %27 : vector<2x8xf32>
    %cst_6 = arith.constant 0.000000e+00 : f32
    %38 = vector.broadcast %cst_6 : f32 to vector<2x8xf32>
    %cst_7 = arith.constant 0.000000e+00 : f32
    %39 = vector.broadcast %cst_7 : f32 to vector<2x8x32xf32>
    %40 = arith.subf %17, %37 : vector<2x8xf32>
    %41 = math.exp %40 : vector<2x8xf32>
    %42 = arith.addf %38, %41 : vector<2x8xf32>
    %43 = vector.shape_cast %41 : vector<2x8xf32> to vector<2x8x1xf32>
    %44 = vector.extract_strided_slice %0 {offsets = [0, 0, 0], sizes = [2, 8, 32], strides = [1, 1, 1]} : vector<2x18x32xf32> to vector<2x8x32xf32>
    %45 = vector.broadcast %43 : vector<2x8x1xf32> to vector<2x8x32xf32>
    %46 = arith.mulf %45, %44 : vector<2x8x32xf32>
    %47 = arith.addf %39, %46 : vector<2x8x32xf32>
    %48 = arith.subf %18, %37 : vector<2x8xf32>
    %49 = math.exp %48 : vector<2x8xf32>
    %50 = arith.addf %42, %49 : vector<2x8xf32>
    %51 = vector.shape_cast %49 : vector<2x8xf32> to vector<2x8x1xf32>
    %52 = vector.extract_strided_slice %0 {offsets = [0, 1, 0], sizes = [2, 8, 32], strides = [1, 1, 1]} : vector<2x18x32xf32> to vector<2x8x32xf32>
    %53 = vector.broadcast %51 : vector<2x8x1xf32> to vector<2x8x32xf32>
    %54 = arith.mulf %53, %52 : vector<2x8x32xf32>
    %55 = arith.addf %47, %54 : vector<2x8x32xf32>
    %56 = arith.subf %19, %37 : vector<2x8xf32>
    %57 = math.exp %56 : vector<2x8xf32>
    %58 = arith.addf %50, %57 : vector<2x8xf32>
    %59 = vector.shape_cast %57 : vector<2x8xf32> to vector<2x8x1xf32>
    %60 = vector.extract_strided_slice %0 {offsets = [0, 2, 0], sizes = [2, 8, 32], strides = [1, 1, 1]} : vector<2x18x32xf32> to vector<2x8x32xf32>
    %61 = vector.broadcast %59 : vector<2x8x1xf32> to vector<2x8x32xf32>
    %62 = arith.mulf %61, %60 : vector<2x8x32xf32>
    %63 = arith.addf %55, %62 : vector<2x8x32xf32>
    %64 = arith.subf %20, %37 : vector<2x8xf32>
    %65 = math.exp %64 : vector<2x8xf32>
    %66 = arith.addf %58, %65 : vector<2x8xf32>
    %67 = vector.shape_cast %65 : vector<2x8xf32> to vector<2x8x1xf32>
    %68 = vector.extract_strided_slice %0 {offsets = [0, 3, 0], sizes = [2, 8, 32], strides = [1, 1, 1]} : vector<2x18x32xf32> to vector<2x8x32xf32>
    %69 = vector.broadcast %67 : vector<2x8x1xf32> to vector<2x8x32xf32>
    %70 = arith.mulf %69, %68 : vector<2x8x32xf32>
    %71 = arith.addf %63, %70 : vector<2x8x32xf32>
    %72 = arith.subf %21, %37 : vector<2x8xf32>
    %73 = math.exp %72 : vector<2x8xf32>
    %74 = arith.addf %66, %73 : vector<2x8xf32>
    %75 = vector.shape_cast %73 : vector<2x8xf32> to vector<2x8x1xf32>
    %76 = vector.extract_strided_slice %0 {offsets = [0, 4, 0], sizes = [2, 8, 32], strides = [1, 1, 1]} : vector<2x18x32xf32> to vector<2x8x32xf32>
    %77 = vector.broadcast %75 : vector<2x8x1xf32> to vector<2x8x32xf32>
    %78 = arith.mulf %77, %76 : vector<2x8x32xf32>
    %79 = arith.addf %71, %78 : vector<2x8x32xf32>
    %80 = arith.subf %22, %37 : vector<2x8xf32>
    %81 = math.exp %80 : vector<2x8xf32>
    %82 = arith.addf %74, %81 : vector<2x8xf32>
    %83 = vector.shape_cast %81 : vector<2x8xf32> to vector<2x8x1xf32>
    %84 = vector.extract_strided_slice %0 {offsets = [0, 5, 0], sizes = [2, 8, 32], strides = [1, 1, 1]} : vector<2x18x32xf32> to vector<2x8x32xf32>
    %85 = vector.broadcast %83 : vector<2x8x1xf32> to vector<2x8x32xf32>
    %86 = arith.mulf %85, %84 : vector<2x8x32xf32>
    %87 = arith.addf %79, %86 : vector<2x8x32xf32>
    %88 = arith.subf %23, %37 : vector<2x8xf32>
    %89 = math.exp %88 : vector<2x8xf32>
    %90 = arith.addf %82, %89 : vector<2x8xf32>
    %91 = vector.shape_cast %89 : vector<2x8xf32> to vector<2x8x1xf32>
    %92 = vector.extract_strided_slice %0 {offsets = [0, 6, 0], sizes = [2, 8, 32], strides = [1, 1, 1]} : vector<2x18x32xf32> to vector<2x8x32xf32>
    %93 = vector.broadcast %91 : vector<2x8x1xf32> to vector<2x8x32xf32>
    %94 = arith.mulf %93, %92 : vector<2x8x32xf32>
    %95 = arith.addf %87, %94 : vector<2x8x32xf32>
    %96 = arith.subf %24, %37 : vector<2x8xf32>
    %97 = math.exp %96 : vector<2x8xf32>
    %98 = arith.addf %90, %97 : vector<2x8xf32>
    %99 = vector.shape_cast %97 : vector<2x8xf32> to vector<2x8x1xf32>
    %100 = vector.extract_strided_slice %0 {offsets = [0, 7, 0], sizes = [2, 8, 32], strides = [1, 1, 1]} : vector<2x18x32xf32> to vector<2x8x32xf32>
    %101 = vector.broadcast %99 : vector<2x8x1xf32> to vector<2x8x32xf32>
    %102 = arith.mulf %101, %100 : vector<2x8x32xf32>
    %103 = arith.addf %95, %102 : vector<2x8x32xf32>
    %104 = arith.subf %25, %37 : vector<2x8xf32>
    %105 = math.exp %104 : vector<2x8xf32>
    %106 = arith.addf %98, %105 : vector<2x8xf32>
    %107 = vector.shape_cast %105 : vector<2x8xf32> to vector<2x8x1xf32>
    %108 = vector.extract_strided_slice %0 {offsets = [0, 8, 0], sizes = [2, 8, 32], strides = [1, 1, 1]} : vector<2x18x32xf32> to vector<2x8x32xf32>
    %109 = vector.broadcast %107 : vector<2x8x1xf32> to vector<2x8x32xf32>
    %110 = arith.mulf %109, %108 : vector<2x8x32xf32>
    %111 = arith.addf %103, %110 : vector<2x8x32xf32>
    %112 = arith.subf %26, %37 : vector<2x8xf32>
    %113 = math.exp %112 : vector<2x8xf32>
    %114 = arith.addf %106, %113 : vector<2x8xf32>
    %115 = vector.shape_cast %113 : vector<2x8xf32> to vector<2x8x1xf32>
    %116 = vector.extract_strided_slice %0 {offsets = [0, 9, 0], sizes = [2, 8, 32], strides = [1, 1, 1]} : vector<2x18x32xf32> to vector<2x8x32xf32>
    %117 = vector.broadcast %115 : vector<2x8x1xf32> to vector<2x8x32xf32>
    %118 = arith.mulf %117, %116 : vector<2x8x32xf32>
    %119 = arith.addf %111, %118 : vector<2x8x32xf32>
    %120 = arith.subf %27, %37 : vector<2x8xf32>
    %121 = math.exp %120 : vector<2x8xf32>
    %122 = arith.addf %114, %121 : vector<2x8xf32>
    %123 = vector.shape_cast %121 : vector<2x8xf32> to vector<2x8x1xf32>
    %124 = vector.extract_strided_slice %0 {offsets = [0, 10, 0], sizes = [2, 8, 32], strides = [1, 1, 1]} : vector<2x18x32xf32> to vector<2x8x32xf32>
    %125 = vector.broadcast %123 : vector<2x8x1xf32> to vector<2x8x32xf32>
    %126 = arith.mulf %125, %124 : vector<2x8x32xf32>
    %127 = arith.addf %119, %126 : vector<2x8x32xf32>
    %128 = tpu.reciprocal %122 {approx = true} : vector<2x8xf32> -> vector<2x8xf32>
    %129 = arith.mulf %122, %128 : vector<2x8xf32>
    %cst_8 = arith.constant 2.000000e+00 : f32
    %130 = vector.broadcast %cst_8 : f32 to vector<2x8xf32>
    %131 = arith.subf %130, %129 : vector<2x8xf32>
    %132 = arith.mulf %128, %131 : vector<2x8xf32>
    %133 = vector.shape_cast %132 : vector<2x8xf32> to vector<2x8x1xf32>
    %134 = vector.broadcast %133 : vector<2x8x1xf32> to vector<2x8x32xf32>
    %135 = arith.mulf %127, %134 : vector<2x8x32xf32>
    %c0_9 = arith.constant 0 : index
    %c0_10 = arith.constant 0 : index
    %c0_11 = arith.constant 0 : index
    %136 = vector.load %arg4[%c0_9, %c0_10, %c0_11] : memref<2x8x32xf32, #tpu.memory_space<vmem>>, vector<2x8x32xf32>
    tpu.vector_store %arg4[%c0_9, %c0_10, %c0_11], %135 {strides = array<i32>} : memref<2x8x32xf32, #tpu.memory_space<vmem>>, vector<2x8x32xf32>,
    return
  }
  func.func @transform_0(%arg0: i32) -> (i32, i32, i32) {
    %c0_i32 = arith.constant 0 : i32
    %c0_i32_0 = arith.constant 0 : i32
    %c0_i32_1 = arith.constant 0 : i32
    return %arg0, %c0_i32, %c0_i32_0 : i32, i32, i32
  }
  func.func @transform_1(%arg0: i32) -> (i32, i32) {
    %c0_i32 = arith.constant 0 : i32
    %c0_i32_0 = arith.constant 0 : i32
    %c0_i32_1 = arith.constant 0 : i32
    return %c0_i32, %c0_i32_0 : i32, i32
  }
  func.func @transform_2(%arg0: i32) -> i32 {
    %c0_i32 = arith.constant 0 : i32
    %c0_i32_0 = arith.constant 0 : i32
    return %c0_i32 : i32
  }
  func.func @transform_3(%arg0: i32) -> (i32, i32, i32) {
    %c0_i32 = arith.constant 0 : i32
    %c0_i32_0 = arith.constant 0 : i32
    %c0_i32_1 = arith.constant 0 : i32
    return %arg0, %c0_i32, %c0_i32_0 : i32, i32, i32
  }
}

</mosaic_0001>

<bundles_post_ra>
// kernel: tpu_custom_call.1
= control target key start
LH: loop header
LB: loop body
LE: loop exit
PB: predicated region body
PF: predicated region fallthrough
CT: control target
= control target key end

     0   :  { %vm36_vm0 = vcmask 261120   ;;  %s931_s0 = inlined_call_operand.vmem [shape: f32[2,18,32], index: 0, kind: input, shape index: {}]   ;;  %s932_s1 = inlined_call_operand.vmem [shape: f32[1,32], index: 1, kind: input, shape index: {}]   ;;  %s933_s2 = inlined_call_operand.<no memory space> [shape: f32[1], index: 2, kind: input, shape index: {}]   ;;  %s934_s3 = inlined_call_operand.hbm [shape: f32[2,8,32], index: 3, kind: output, shape index: {}]  }
   0x1   :  { %v717_v0 = vld [vmem:[%s931_s0 + $0x18] sm:$0xff]  ;;  %v603_v1 = vld [vmem:[%s932_s1] ss:$0 sm:$0xff]  ;;  %v737_v6 = vld [vmem:[%s931_s0 + $0x8] sm:$0xff] }
   0x2   :  { %v725_v2 = vld [vmem:[%s931_s0] sm:$0xff]  ;;  %v33_v3 = vmul.f32 %v603_v1, %v717_v0  ;;  %v31_v8 = vmul.f32 %v603_v1, %v737_v6  ;;  %v744_v9 = vld [vmem:[%s931_s0 + $0x28] sm:$0x3]  ;;  %v749_v10 = vld [vmem:[%s931_s0 + $0x10] sm:$0x3] }
   0x3   :  { %v30_v4 = vmul.f32 %v603_v1, %v725_v2  ;;  %v732_v5 = vld [vmem:[%s931_s0 + $0x20] sm:$0xff] }
   0x4   :  { %v34_v7 = vmul.f32 %v603_v1, %v732_v5 }
   0x5   :  { %9 = vsyncpa [#allocation4], 0  ;;  %v47_v11 = vsel %vm36_vm0, %v33_v3, 0.0  ;;  %v37_v12 = vsel %vm36_vm0, %v30_v4, 0.0  ;;  %v40_v14 = vsel %vm36_vm0, %v31_v8, 0.0  ;;  %v35_v15 = vmul.f32 %v603_v1, %v744_v9  ;;  %s673_s26 = smov 127  }
   0x6   :  { %48 = vadd.xlane.f32.xlu1 %v47_v11  ;;  %38 = vadd.xlane.f32.xlu0 %v37_v12  ;;  %v50_v13 = vsel %vm36_vm0, %v34_v7, 0.0  ;;  %v32_v16 = vmul.f32 %v603_v1, %v749_v10  ;;  %vm43_vm1 = vcmask 254976   ;;  %v63_v19 = vlaneseq  ;;  %s674_s27 = smov 125   ;;  %s675_s28 = smov 123  }
   0x7   :  { %v53_v17 = vsel %vm43_vm1, %v35_v15, 0.0  ;;  %v56_v25 = vstv %s933_s2  ;;  %vm83_vm4 = vcmask 130112   ;;  %vm90_vm5 = vcmask 195712   ;;  %s672_s2 = smov 126   ;;  %s676_s29 = smov 124  }
   0x8   :  { %v44_v18 = vsel %vm43_vm1, %v32_v16, 0.0  ;;  %v64_v20 = vand.u32 127, %v63_v19  ;;  %v757_v24 = vshrl.u32 %v63_v19, 7  ;;  %vm106_vm6 = vcmask 1041409   ;;  %s677_s30 = smov 121   ;;  %s678_s4 = smov 122  }
   0x9   :  { %s679_s5 = smov 119   ;;  %s680_s6 = smov 120   ;;  %vm205_vm8 = vcmask 1046528   ;;  %vm245_vm9 = vcmask 1045504   ;;  %vm285_vm10 = vcmask 1044480   ;;  %vm325_vm11 = vcmask 1043456  }
   0xa   :  { %51 = vadd.xlane.f32.xlu1 %v50_v13  ;;  %41 = vadd.xlane.f32.xlu0 %v40_v14  ;;  %v78_v23 = vadd.s32 4294967288, %v64_v20  ;;  %v85_v26 = vadd.s32 4294967280, %v64_v20  ;;  %v76_v32 = vsub.s32 %v64_v20, %v757_v24  ;;  %vm65_vm2 = vcmp.ge.s32.totalorder %v64_v20, 5  ;;  %s681_s7 = smov 118   ;;  %s682_s8 = smov 2  }
   0xb   :  { %vm66_vm3 = vcmp.lt.s32.totalorder %v64_v20, 13  ;;  %s683_s9 = smov 1   ;;  %s684_s10 = smov 4   ;;  %vm365_vm12 = vcmask 1042432   ;;  %vm405_vm13 = vcmask 1041408   ;;  %vm445_vm14 = vcmask 1040384  }
   0xc   :  { %v81_v27 = vsub.s32 %v78_v23, %v757_v24  ;;  %v88_v35 = vsub.s32 %v85_v26, %v757_v24  ;;  %vm67_vm7 = vmand %vm65_vm2, %vm66_vm3  ;;  %s685_s11 = smov 3   ;;  %s686_s12 = smov 6  }
   0xd   :  { %s687_s13 = smov 5   ;;  %s688_s14 = smov 8  }
   0xe   :  { %54 = vadd.xlane.f32.xlu1 %v53_v17  ;;  %45 = vadd.xlane.f32.xlu0 %v44_v18  ;;  %s689_s15 = smov 7   ;;  %s690_s16 = smov 10  }
   0xf   :  { %s691_s17 = smov 9   ;;  %s692_s18 = smov [#allocation3]  }
  0x10   :  { %s592_s19 = sshll.u32 %s692_s18, 4  ;;  %s593_s19 = int_to_ptr.vmem [resolvable:$true] %s592_s19 }
  0x11   :  { %s650_s20 = scalar_lea.vmem %s593_s19, 256  ;;  %p655_p1 = scmp.lt.s32.totalorder %s593_s19, %s593_s19 }
  0x12   :  { %p651_p0 = scmp.ne.s32.totalorder %s593_s19, %s650_s20  ;;  %p656_p2 = scmp.lt.s32.totalorder %s650_s20, %s650_s20 }
  0x14   :  { %p657_p3 = por %p656_p2, %p655_p1 }
  0x16   :  { %p658_p4 = pnand %p657_p3, %p651_p0 }
  0x8f   :  { %v49_v21 = vpop.xlane.xlu1 %48  ;;  %v39_v22 = vpop.xlane.xlu0 %38 }
  0x90   :  { %v60_v33 = vadd.f32 %v56_v25, %v49_v21  ;;  %v57_v34 = vadd.f32 %v56_v25, %v39_v22 }
  0x92   :  { %v95_v42 = vrot.slane %v60_v33, %v76_v32  ;;  %v77_v43 = vrot.slane %v57_v34, %v76_v32 }
  0x93   :  { %v52_v28 = vpop.xlane.xlu1 %51  ;;  %v42_v29 = vpop.xlane.xlu0 %41 }
  0x94   :  { %v61_v30 = vadd.f32 %v56_v25, %v52_v28  ;;  %v58_v31 = vadd.f32 %v56_v25, %v42_v29 }
  0x96   :  { %v99_v36 = vrot.slane %v61_v30, %v81_v27  ;;  %v82_v37 = vrot.slane %v58_v31, %v81_v27 }
  0x97   :  { %v55_v38 = vpop.xlane.xlu1 %54  ;;  %v46_v39 = vpop.xlane.xlu0 %45 }
  0x98   :  { %v62_v40 = vadd.f32 %v56_v25, %v55_v38  ;;  %v59_v41 = vadd.f32 %v56_v25, %v46_v39  ;;  %v100_v46 = vsel %vm83_vm4, %v99_v36, %v95_v42  ;;  %v84_v47 = vsel %vm83_vm4, %v82_v37, %v77_v43 }
  0x9a   :  { %v104_v44 = vrot.slane %v62_v40, %v88_v35  ;;  %v89_v45 = vrot.slane %v59_v41, %v88_v35 }
  0x9c   :  { %v105_v48 = vsel %vm90_vm5, %v104_v44, %v100_v46  ;;  %v91_v49 = vsel %vm90_vm5, %v89_v45, %v84_v47 }
  0x9d   :  { %v107_v50 = vsel %vm106_vm6, %v105_v48, %v91_v49 }
  0x9e   :  { %v766_v51 = vsel %vm67_vm7, %v107_v50, -1e+30 }
  0x9f   :  { %115 = vrot.lane.b32.xlu1 %v766_v51, %s672_s2  ;;  %111 = vrot.lane.b32.xlu0 %v766_v51, %s673_s26 }
  0xa3   :  { %119 = vrot.lane.b32.xlu1 %v766_v51, %s674_s27  ;;  %127 = vrot.lane.b32.xlu0 %v766_v51, %s675_s28 }
  0xa7   :  { %123 = vrot.lane.b32.xlu1 %v766_v51, %s676_s29  ;;  %135 = vrot.lane.b32.xlu0 %v766_v51, %s677_s30 }
  0xab   :  { %131 = vrot.lane.b32.xlu1 %v766_v51, %s678_s4  ;;  %143 = vrot.lane.b32.xlu0 %v766_v51, %s679_s5 }
  0xaf   :  { %139 = vrot.lane.b32.xlu1 %v766_v51, %s680_s6 }
  0xb3   :  { %147 = vrot.lane.b32.xlu1 %v766_v51, %s681_s7 }
 0x111   :  { %v116_v52 = vpop.permute.xlu1 %115  ;;  %v112_v53 = vpop.permute.xlu0 %111 }
 0x112   :  { %v114_v54 = vmax.f32 %v766_v51, %v112_v53 }
 0x114   :  { %v118_v55 = vmax.f32 %v114_v54, %v116_v52 }
 0x115   :  { %v120_v56 = vpop.permute.xlu1 %119  ;;  %v128_v57 = vpop.permute.xlu0 %127 }
 0x116   :  { %v122_v58 = vmax.f32 %v118_v55, %v120_v56  ;;  %v810_v56 = vsub.s32 1, %v757_v24 }
 0x119   :  { %v124_v59 = vpop.permute.xlu1 %123  ;;  %v136_v62 = vpop.permute.xlu0 %135 }
 0x11a   :  { %v126_v60 = vmax.f32 %v122_v58, %v124_v59  ;;  %v813_v58 = vsub.s32 0, %v757_v24 }
 0x11c   :  { %v130_v61 = vmax.f32 %v126_v60, %v128_v57 }
 0x11d   :  { %v132_v63 = vpop.permute.xlu1 %131  ;;  %v144_v8 = vpop.permute.xlu0 %143 }
 0x11e   :  { %v134_v1 = vmax.f32 %v130_v61, %v132_v63 }
 0x120   :  { %v138_v3 = vmax.f32 %v134_v1, %v136_v62 }
 0x121   :  { %v140_v4 = vpop.permute.xlu1 %139 }
 0x122   :  { %v142_v7 = vmax.f32 %v138_v3, %v140_v4 }
 0x124   :  { %v146_v11 = vmax.f32 %v142_v7, %v144_v8 }
 0x125   :  { %v148_v12 = vpop.permute.xlu1 %147 }
 0x126   :  { %v150_v13 = vmax.f32 %v146_v11, %v148_v12 }
 0x128   :  { %218 = vrot.lane.b32.xlu1 %v150_v13, %s682_s8  ;;  %174 = vrot.lane.b32.xlu0 %v150_v13, %s683_s9  ;;  %v151_v35 = vsub.f32 %v766_v51, %v150_v13 }
 0x12a   :  { %v152_v42 = vmul.f32 1.442695, %v151_v35 }
 0x12c   :  { %298 = vrot.lane.b32.xlu1 %v150_v13, %s684_s10  ;;  %258 = vrot.lane.b32.xlu0 %v150_v13, %s685_s11 }
 0x130   :  { %378 = vrot.lane.b32.xlu1 %v150_v13, %s686_s12  ;;  %338 = vrot.lane.b32.xlu0 %v150_v13, %s687_s13 }
 0x134   :  { %458 = vrot.lane.b32.xlu1 %v150_v13, %s688_s14  ;;  %418 = vrot.lane.b32.xlu0 %v150_v13, %s689_s15 }
 0x138   :  { %528 = vrot.lane.b32.xlu1 %v150_v13, %s690_s16  ;;  %489 = vrot.lane.b32.xlu0 %v150_v13, %s691_s17 }
 0x19a   :  { %v219_v14 = vpop.permute.xlu1 %218  ;;  %v175_v15 = vpop.permute.xlu0 %174 }
 0x19b   :  { %v221_v16 = vsub.f32 %v766_v51, %v219_v14  ;;  %v177_v17 = vsub.f32 %v766_v51, %v175_v15 }
 0x19d   :  { %v222_v18 = vmul.f32 1.442695, %v221_v16  ;;  %v178_v19 = vmul.f32 1.442695, %v177_v17 }
 0x19e   :  { %v299_v20 = vpop.permute.xlu1 %298  ;;  %v259_v21 = vpop.permute.xlu0 %258 }
 0x19f   :  { %626 = vpow2.f32 %v222_v18  ;;  %v301_v22 = vsub.f32 %v766_v51, %v299_v20  ;;  %v261_v23 = vsub.f32 %v766_v51, %v259_v21 }
 0x1a0   :  { %628 = vpow2.f32 %v178_v19 }
 0x1a1   :  { %v302_v25 = vmul.f32 1.442695, %v301_v22  ;;  %v262_v26 = vmul.f32 1.442695, %v261_v23 }
 0x1a2   :  { %v379_v27 = vpop.permute.xlu1 %378  ;;  %v339_v28 = vpop.permute.xlu0 %338 }
 0x1a3   :  { %630 = vpow2.f32 %v302_v25  ;;  %v381_v29 = vsub.f32 %v766_v51, %v379_v27  ;;  %v341_v30 = vsub.f32 %v766_v51, %v339_v28 }
 0x1a4   :  { %632 = vpow2.f32 %v262_v26 }
 0x1a5   :  { %v382_v31 = vmul.f32 1.442695, %v381_v29  ;;  %v342_v32 = vmul.f32 1.442695, %v341_v30 }
 0x1a6   :  { %v459_v33 = vpop.permute.xlu1 %458  ;;  %v419_v34 = vpop.permute.xlu0 %418 }
 0x1a7   :  { %634 = vpow2.f32 %v382_v31  ;;  %v461_v36 = vsub.f32 %v766_v51, %v459_v33  ;;  %v421_v37 = vsub.f32 %v766_v51, %v419_v34 }
 0x1a8   :  { %636 = vpow2.f32 %v342_v32 }
 0x1a9   :  { %v462_v38 = vmul.f32 1.442695, %v461_v36  ;;  %v422_v39 = vmul.f32 1.442695, %v421_v37 }
 0x1aa   :  { %v529_v40 = vpop.permute.xlu1 %528  ;;  %v490_v41 = vpop.permute.xlu0 %489 }
 0x1ab   :  { %638 = vpow2.f32 %v462_v38  ;;  %v531_v43 = vsub.f32 %v766_v51, %v529_v40  ;;  %v492_v44 = vsub.f32 %v766_v51, %v490_v41 }
 0x1ac   :  { %v627_v45 = vpop.eup %626  ;;  %640 = vpow2.f32 %v422_v39 }
 0x1ad   :  { %v629_v46 = vpop.eup %628  ;;  %v532_v47 = vmul.f32 1.442695, %v531_v43  ;;  %v493_v48 = vmul.f32 1.442695, %v492_v44  ;;  %225 = vrot.lane.b32.xlu1 %v627_v45, %s672_s2  ;;  %642 = vpow2.f32 %v152_v42  ;;  %v240_v24 = vrot.slane %v627_v45, %v810_v56 }
 0x1ae   :  { %181 = vrot.lane.b32.xlu0 %v629_v46, %s673_s26  ;;  %v196_v62 = vrot.slane %v629_v46, %v810_v56  ;;  %v188_v63 = vrot.slane %v629_v46, %v813_v58  ;;  %v232_v1 = vrot.slane %v627_v45, %v813_v58 }
 0x1af   :  { %644 = vpow2.f32 %v532_v47 }
 0x1b0   :  { %v631_v49 = vpop.eup %630  ;;  %646 = vpow2.f32 %v493_v48 }
 0x1b1   :  { %v633_v50 = vpop.eup %632  ;;  %305 = vrot.lane.b32.xlu1 %v631_v49, %s676_s29  ;;  %v320_v7 = vrot.slane %v631_v49, %v810_v56  ;;  %v312_v8 = vrot.slane %v631_v49, %v813_v58 }
 0x1b2   :  { %265 = vrot.lane.b32.xlu0 %v633_v50, %s674_s27  ;;  %v280_v3 = vrot.slane %v633_v50, %v810_v56  ;;  %v272_v4 = vrot.slane %v633_v50, %v813_v58 }
 0x1b4   :  { %v635_v52 = vpop.eup %634 }
 0x1b5   :  { %v637_v51 = vpop.eup %636  ;;  %385 = vrot.lane.b32.xlu1 %v635_v52, %s678_s4  ;;  %v400_v13 = vrot.slane %v635_v52, %v810_v56  ;;  %v392_v14 = vrot.slane %v635_v52, %v813_v58 }
 0x1b6   :  { %345 = vrot.lane.b32.xlu0 %v637_v51, %s675_s28  ;;  %v360_v11 = vrot.slane %v637_v51, %v810_v56  ;;  %v352_v12 = vrot.slane %v637_v51, %v813_v58 }
 0x1b8   :  { %v639_v53 = vpop.eup %638 }
 0x1b9   :  { %v641_v54 = vpop.eup %640  ;;  %465 = vrot.lane.b32.xlu1 %v639_v53, %s680_s6  ;;  %v480_v17 = vrot.slane %v639_v53, %v810_v56  ;;  %v472_v18 = vrot.slane %v639_v53, %v813_v58 }
 0x1ba   :  { %425 = vrot.lane.b32.xlu0 %v641_v54, %s677_s30  ;;  %v643_v55 = vpop.eup %642  ;;  %v440_v15 = vrot.slane %v641_v54, %v810_v56  ;;  %v432_v16 = vrot.slane %v641_v54, %v813_v58 }
 0x1bb   :  { %v165_v60 = vrot.slane %v643_v55, %v810_v56  ;;  %v158_v61 = vrot.slane %v643_v55, %v813_v58 }
 0x1bc   :  { %v645_v57 = vpop.eup %644 }
 0x1bd   :  { %v647_v59 = vpop.eup %646  ;;  %535 = vrot.lane.b32.xlu1 %v645_v57, %s681_s7  ;;  %v550_v21 = vrot.slane %v645_v57, %v810_v56  ;;  %v542_v22 = vrot.slane %v645_v57, %v813_v58 }
 0x1be   :  { %496 = vrot.lane.b32.xlu0 %v647_v59, %s679_s5  ;;  %v511_v19 = vrot.slane %v647_v59, %v810_v56  ;;  %v503_v20 = vrot.slane %v647_v59, %v813_v58 }
 0x1c1   :  { %167 = vbcast.lane.b32.xlu1 %v165_v60, 256 }
 0x1c2   :  { %160 = vbcast.lane.b32.xlu0 %v158_v61, 256 }
 0x1c5   :  { %199 = vbcast.lane.b32.xlu1 %v196_v62, 257 }
 0x1c6   :  { %191 = vbcast.lane.b32.xlu0 %v188_v63, 257 }
 0x1c9   :  { %243 = vbcast.lane.b32.xlu1 %v240_v24, 258  ;;  %v206_v24 = vrot.slane %v725_v2, 1 }
 0x1ca   :  { %235 = vbcast.lane.b32.xlu0 %v232_v1, 258  ;;  %v207_v1 = vrot.slane %v737_v6, 1 }
 0x1cd   :  { %283 = vbcast.lane.b32.xlu1 %v280_v3, 259 }
 0x1ce   :  { %275 = vbcast.lane.b32.xlu0 %v272_v4, 259 }
 0x1d1   :  { %323 = vbcast.lane.b32.xlu1 %v320_v7, 260 }
 0x1d2   :  { %315 = vbcast.lane.b32.xlu0 %v312_v8, 260  ;;  %v208_v8 = vsel %vm205_vm8, %v206_v24, %v207_v1 }
 0x1d5   :  { %363 = vbcast.lane.b32.xlu1 %v360_v11, 261  ;;  %v249_v11 = vrot.slane %v717_v0, 2 }
 0x1d6   :  { %355 = vbcast.lane.b32.xlu0 %v352_v12, 261  ;;  %v250_v12 = vrot.slane %v732_v5, 2 }
 0x1d9   :  { %403 = vbcast.lane.b32.xlu1 %v400_v13, 262  ;;  %v246_v13 = vrot.slane %v725_v2, 2 }
 0x1da   :  { %395 = vbcast.lane.b32.xlu0 %v392_v14, 262  ;;  %v247_v14 = vrot.slane %v737_v6, 2 }
 0x1dd   :  { %443 = vbcast.lane.b32.xlu1 %v440_v15, 263  ;;  %v289_v15 = vrot.slane %v717_v0, 3 }
 0x1de   :  { %435 = vbcast.lane.b32.xlu0 %v432_v16, 263  ;;  %v290_v16 = vrot.slane %v732_v5, 3 }
 0x1e1   :  { %483 = vbcast.lane.b32.xlu1 %v480_v17, 264  ;;  %v286_v17 = vrot.slane %v725_v2, 3 }
 0x1e2   :  { %475 = vbcast.lane.b32.xlu0 %v472_v18, 264  ;;  %v287_v18 = vrot.slane %v737_v6, 3 }
 0x1e5   :  { %514 = vbcast.lane.b32.xlu1 %v511_v19, 265  ;;  %v329_v19 = vrot.slane %v717_v0, 4 }
 0x1e6   :  { %506 = vbcast.lane.b32.xlu0 %v503_v20, 265  ;;  %v330_v20 = vrot.slane %v732_v5, 4 }
 0x1e9   :  { %553 = vbcast.lane.b32.xlu1 %v550_v21, 266  ;;  %v326_v21 = vrot.slane %v725_v2, 4 }
 0x1ea   :  { %545 = vbcast.lane.b32.xlu0 %v542_v22, 266  ;;  %v327_v22 = vrot.slane %v737_v6, 4 }
 0x21f   :  { %v226_v23 = vpop.permute.xlu1 %225 }
 0x220   :  { %v182_v25 = vpop.permute.xlu0 %181 }
 0x221   :  { %v184_v26 = vadd.f32 %v643_v55, %v182_v25  ;;  %v370_v25 = vrot.slane %v732_v5, 5 }
 0x223   :  { %v306_v27 = vpop.permute.xlu1 %305  ;;  %v228_v28 = vadd.f32 %v226_v23, %v184_v26  ;;  %v369_v23 = vrot.slane %v717_v0, 5  ;;  %v366_v26 = vrot.slane %v725_v2, 5 }
 0x224   :  { %v266_v29 = vpop.permute.xlu0 %265 }
 0x225   :  { %v268_v30 = vadd.f32 %v266_v29, %v228_v28 }
 0x227   :  { %v386_v31 = vpop.permute.xlu1 %385  ;;  %v308_v32 = vadd.f32 %v306_v27, %v268_v30  ;;  %v367_v27 = vrot.slane %v737_v6, 5  ;;  %v251_v30 = vsel %vm245_vm9, %v249_v11, %v250_v12 }
 0x228   :  { %v346_v33 = vpop.permute.xlu0 %345 }
 0x229   :  { %v348_v34 = vadd.f32 %v346_v33, %v308_v32  ;;  %v291_v32 = vsel %vm285_vm10, %v289_v15, %v290_v16  ;;  %v288_v33 = vsel %vm285_vm10, %v286_v17, %v287_v18 }
 0x22b   :  { %v388_v35 = vadd.f32 %v386_v31, %v348_v34  ;;  %v466_v36 = vpop.permute.xlu1 %465  ;;  %v248_v31 = vsel %vm245_vm9, %v246_v13, %v247_v14 }
 0x22c   :  { %v426_v37 = vpop.permute.xlu0 %425 }
 0x22d   :  { %v428_v38 = vadd.f32 %v426_v37, %v388_v35  ;;  %v328_v37 = vsel %vm325_vm11, %v326_v21, %v327_v22  ;;  %v518_v21 = vrot.slane %v749_v10, 1 }
 0x22f   :  { %v468_v39 = vadd.f32 %v466_v36, %v428_v38  ;;  %v536_v42 = vpop.permute.xlu1 %535  ;;  %v331_v36 = vsel %vm325_vm11, %v329_v19, %v330_v20  ;;  %v371_v38 = vsel %vm365_vm12, %v369_v23, %v370_v25  ;;  %v520_v19 = vrot.slane %v744_v9, 1 }
 0x230   :  { %v497_v40 = vpop.permute.xlu0 %496 }
 0x231   :  { %v499_v41 = vadd.f32 %v497_v40, %v468_v39  ;;  %v368_v39 = vsel %vm365_vm12, %v366_v26, %v367_v27  ;;  %v409_v40 = vrot.slane %v717_v0, 6  ;;  %v557_v26 = vrot.slane %v744_v9, 2 }
 0x233   :  { %v538_v43 = vadd.f32 %v536_v42, %v499_v41  ;;  %v168_v50 = vpop.permute.xlu1 %167  ;;  %v410_v41 = vrot.slane %v732_v5, 6 }
 0x234   :  { %v161_v52 = vpop.permute.xlu0 %160  ;;  %v170_v42 = vmul.f32 %v168_v50, %v717_v0  ;;  %v450_v50 = vrot.slane %v732_v5, 7 }
 0x235   :  { %648 = vrcp.f32 %v538_v43 }
 0x237   :  { %v200_v51 = vpop.permute.xlu1 %199 }
 0x238   :  { %v192_v53 = vpop.permute.xlu0 %191 }
 0x239   :  { %v214_v35 = vmul.f32 %v208_v8, %v192_v53 }
 0x23b   :  { %v244_v54 = vpop.permute.xlu1 %243 }
 0x23c   :  { %v236_v55 = vpop.permute.xlu0 %235 }
 0x23f   :  { %v284_v57 = vpop.permute.xlu1 %283 }
 0x240   :  { %v276_v59 = vpop.permute.xlu0 %275  ;;  %v295_v24 = vmul.f32 %v291_v32, %v284_v57 }
 0x242   :  { %v649_v44 = vpop.eup %648 }
 0x243   :  { %v566_v45 = vmul.f32 %v649_v44, %v538_v43  ;;  %v841_v60 = vpop.permute.xlu1 %323  ;;  %v169_v43 = vmul.f32 %v161_v52, %v725_v2  ;;  %v446_v52 = vrot.slane %v725_v2, 7 }
 0x244   :  { %v843_v61 = vpop.permute.xlu0 %315  ;;  %v335_v11 = vmul.f32 %v331_v36, %v841_v60 }
 0x245   :  { %v567_v46 = vsub.f32 2.0, %v566_v45  ;;  %v254_v45 = vmul.f32 %v248_v31, %v236_v55  ;;  %v334_v13 = vmul.f32 %v328_v37, %v843_v61 }
 0x247   :  { %v568_v47 = vmul.f32 %v649_v44, %v567_v46  ;;  %v845_v62 = vpop.permute.xlu1 %363  ;;  %v255_v44 = vmul.f32 %v251_v30, %v244_v54  ;;  %v406_v46 = vrot.slane %v725_v2, 6  ;;  %v447_v54 = vrot.slane %v737_v6, 7 }
 0x248   :  { %v847_v63 = vpop.permute.xlu0 %355 }
 0x249   :  { %v579_v48 = vrot.slane %v568_v47, %v810_v56  ;;  %v572_v49 = vrot.slane %v568_v47, %v813_v58  ;;  %v209_v56 = vrot.slane %v717_v0, 1  ;;  %v210_v58 = vrot.slane %v732_v5, 1 }
 0x24a   :  { %v407_v47 = vrot.slane %v737_v6, 6  ;;  %v374_v17 = vmul.f32 %v368_v39, %v847_v63  ;;  %v448_v2 = vsel %vm445_vm14, %v446_v52, %v447_v54 }
 0x24b   :  { %581 = vbcast.lane.b32.xlu1 %v579_v48, 256  ;;  %574 = vbcast.lane.b32.xlu0 %v572_v49, 256  ;;  %v853_v3 = vpop.permute.xlu1 %403  ;;  %v211_v7 = vsel %vm205_vm8, %v209_v56, %v210_v58  ;;  %v449_v48 = vrot.slane %v717_v0, 7  ;;  %v216_v56 = vadd.f32 %v214_v35, %v169_v43  ;;  %v411_v0 = vsel %vm405_vm13, %v409_v40, %v410_v41 }
 0x24c   :  { %v855_v4 = vpop.permute.xlu0 %395  ;;  %v215_v34 = vmul.f32 %v211_v7, %v200_v51  ;;  %v294_v7 = vmul.f32 %v288_v33, %v276_v59  ;;  %v408_v15 = vsel %vm405_vm13, %v406_v46, %v407_v47  ;;  %v375_v59 = vmul.f32 %v371_v38, %v845_v62 }
 0x24d   :  { %v256_v8 = vadd.f32 %v254_v45, %v216_v56  ;;  %v451_v18 = vsel %vm445_vm14, %v449_v48, %v450_v50  ;;  %v415_v23 = vmul.f32 %v411_v0, %v853_v3  ;;  %v414_v25 = vmul.f32 %v408_v15, %v855_v4 }
 0x24e   :  { %v217_v53 = vadd.f32 %v215_v34, %v170_v42  ;;  %v555_v62 = vrot.slane %v749_v10, 2  ;;  %v521_v32 = vsel %vm205_vm8, %v210_v58, %v520_v19  ;;  %v519_v33 = vsel %vm205_vm8, %v207_v1, %v518_v21 }
 0x24f   :  { %v444_v28 = vpop.permute.xlu1 %443  ;;  %v296_v57 = vadd.f32 %v294_v7, %v256_v8  ;;  %v558_v10 = vsel %vm245_vm9, %v250_v12, %v557_v26 }
 0x250   :  { %v436_v29 = vpop.permute.xlu0 %435  ;;  %v257_v55 = vadd.f32 %v255_v44, %v217_v53  ;;  %v455_v30 = vmul.f32 %v451_v18, %v444_v28 }
 0x251   :  { %v336_v61 = vadd.f32 %v334_v13, %v296_v57  ;;  %v454_v31 = vmul.f32 %v448_v2, %v436_v29  ;;  %v556_v29 = vsel %vm245_vm9, %v247_v14, %v555_v62 }
 0x252   :  { %v297_v16 = vadd.f32 %v295_v24, %v257_v55 }
 0x253   :  { %v484_v49 = vpop.permute.xlu1 %483  ;;  %v376_v63 = vadd.f32 %v374_v17, %v336_v61 }
 0x254   :  { %v476_v51 = vpop.permute.xlu0 %475  ;;  %v337_v22 = vadd.f32 %v335_v11, %v297_v16  ;;  %v486_v4 = vmul.f32 %v484_v49, %v732_v5 }
 0x255   :  { %v416_v3 = vadd.f32 %v414_v25, %v376_v63  ;;  %v485_v9 = vmul.f32 %v476_v51, %v737_v6 }
 0x256   :  { %v377_v27 = vadd.f32 %v375_v59, %v337_v22 }
 0x257   :  { %v515_v20 = vpop.permute.xlu1 %514  ;;  %v456_v36 = vadd.f32 %v454_v31, %v416_v3 }
 0x258   :  { %v507_v60 = vpop.permute.xlu0 %506  ;;  %v417_v34 = vadd.f32 %v415_v23, %v377_v27  ;;  %v525_v37 = vmul.f32 %v521_v32, %v515_v20 }
 0x259   :  { %v524_v1 = vmul.f32 %v519_v33, %v507_v60  ;;  %v487_v39 = vadd.f32 %v485_v9, %v456_v36 }
 0x25a   :  { %v457_v35 = vadd.f32 %v455_v30, %v417_v34 }
 0x25b   :  { %v554_v28 = vpop.permute.xlu1 %553  ;;  %v526_v43 = vadd.f32 %v524_v1, %v487_v39 }
 0x25c   :  { %v546_v58 = vpop.permute.xlu0 %545  ;;  %v488_v38 = vadd.f32 %v486_v4, %v457_v35  ;;  %v562_v40 = vmul.f32 %v558_v10, %v554_v28 }
 0x25d   :  { %v561_v41 = vmul.f32 %v556_v29, %v546_v58 }
 0x25e   :  { %v527_v42 = vadd.f32 %v525_v37, %v488_v38 }
 0x25f   :  { %v563_v12 = vadd.f32 %v561_v41, %v526_v43 }
 0x260   :  { %v564_v5 = vadd.f32 %v562_v40, %v527_v42 }
 0x2bd   :  { %v582_v44 = vpop.permute.xlu1 %581  ;;  %v575_v45 = vpop.permute.xlu0 %574 }
 0x2be   :  { %v584_v6 = vmul.f32 %v582_v44, %v564_v5  ;;  %v583_v46 = vmul.f32 %v575_v45, %v563_v12 }
 0x2c0   :  { %586 = vst.msk [vmem:[#allocation3 + $0x8] sm:$0xff] %vm36_vm0, %v584_v6  ;;  %585 = vst.msk [vmem:[#allocation3] sm:$0xff] %vm36_vm0, %v583_v46 }
 0x2c1   :  { %661 = shalt.err (!%p658_p4)
}
 0x2c2   :  { %s693_s21 = smov 128  }
 0x2c3   :  { %598 = dma.vmem_to_hbm [thread:$0]  %s593_s19, 256, %s934_s3, [#allocation4], %s693_s21, %s693_s21, %s688_s14  }
 0x2c4   :  { %670 = dma.done.wait [#allocation4], 256  }
 0x2c5   :  { %671 = vsyncadd [#allocation4], 4294967040 }
 0x2c6   :  { %602 = vsyncpa [#allocation4], 1 }

</bundles_post_ra>
